<compile_context>
chip_gen: v7x
topology: tpu7x:2x2x1
jax: 0.10.0
libtpu: 0.0.40
codegen_flags: <defaults>
</compile_context>

<pallas_src>
import math

import jax
import jax.numpy as jnp
from jax.experimental import pallas as pl
from jax.experimental.pallas import tpu as pltpu


def _round_up(n, m):
    return ((n + m - 1) // m) * m


def _pick_tile(n, unit, max_tile):
    """Batch-axis tile: multiple of `unit`, <= max_tile, and (when n spans more
    than one unit) small enough that the grid has >= 2 steps so the 'parallel'
    axis can be split across v7x's two TensorCores."""
    t = min(max_tile, _round_up(n, unit))
    if n > unit:
        t = min(t, _round_up(pl.cdiv(n, 2), unit))
    return max(t, unit)


# --------------------------------------------------------------- kernels ----

def _sinusoidal_kernel_rows(x_ref, freq_ref, out_ref):
    """Row layout (used when half % 128 == 0).
    x_ref: (tb, 1) f32, freq_ref: (1, half) f32, out_ref: (tb, 2*half) f32."""
    half = freq_ref.shape[-1]
    t = x_ref[...] * 1000.0                 # x.squeeze() * 1000
    emb = t * freq_ref[...]                 # (tb, half)
    out_ref[:, :half] = jnp.sin(emb)        # lane-aligned full-width stores
    out_ref[:, half:] = jnp.cos(emb)


def _sinusoidal_kernel_t(x_ref, freq_ref, out_ref):
    """Transposed layout (used when half % 128 != 0, e.g. dim=32).
    x_ref: (1, tb) f32 lane-dense row, freq_ref: (half, 1) f32 column,
    out_ref: (2*half, tb) f32.  Every store is a full unmasked 128-lane vst."""
    half = freq_ref.shape[0]
    t = x_ref[...] * 1000.0                 # (1, tb)
    emb = freq_ref[...] * t                 # (half, 1) * (1, tb) -> (half, tb)
    out_ref[:half, :] = jnp.sin(emb)        # sublane slices, 8-aligned offsets
    out_ref[half:, :] = jnp.cos(emb)


# --------------------------------------------------------------- wrapper ----

def sinusoidal_pos_emb(x, dim, *, block_rows=2048, block_lanes=2048):
    """Pallas implementation of SinusoidalPosEmb(dim)(x).

    x: array whose squeeze() is 1-D (e.g. shape (B,), (B,1), (1,B)).
    Returns: (B, dim) float32 embedding, [:, :dim//2]=sin, [:, dim//2:]=cos.
    """
    assert dim % 2 == 0 and dim >= 4, "dim must be even and >= 4"

    x = jnp.squeeze(x)
    if x.ndim == 0:            # batch of size 1: squeeze() yields a scalar
        x = x.reshape(1)
    assert x.ndim == 1, "squeezed input must be 1-D"
    b = x.shape[0]
    half = dim // 2

    # Constant frequency table, computed once in the wrapper (constant-folded).
    scale = math.log(10000.0) / (half - 1)
    freqs = jnp.exp(jnp.arange(half, dtype=jnp.float32) * (-scale))

    # Keep the double-buffered output tile under ~8 MiB: safe inside v5e's
    # 16 MiB scoped-VMEM default; v6e/v7x scoped defaults are >= 32 MiB.
    vmem_cap_elems = (8 << 20) // (2 * dim * 4)

    compiler_params = pltpu.CompilerParams(dimension_semantics=("parallel",))

    # Lane-dense-output gate: transpose when the sin/cos halves would otherwise
    # be masked partial-lane stores (half not a multiple of 128).  Require the
    # sublane split offset to be 8-aligned; otherwise fall back to row layout.
    use_transposed = (half % 128 != 0) and (half % 8 == 0)

    if use_transposed:
        unit = 128
        max_tile = max((min(block_lanes, vmem_cap_elems) // unit) * unit, unit)
        tb = _pick_tile(b, unit, max_tile)
        b_pad = _round_up(b, tb)

        x_row = x.astype(jnp.float32).reshape(1, b)
        if b_pad != b:
            x_row = jnp.pad(x_row, ((0, 0), (0, b_pad - b)))
        freqs_col = freqs.reshape(half, 1)

        out_t = pl.pallas_call(
            _sinusoidal_kernel_t,
            out_shape=jax.ShapeDtypeStruct((dim, b_pad), jnp.float32),
            grid=(b_pad // tb,),
            in_specs=[
                pl.BlockSpec((1, tb), lambda i: (0, i)),      # timesteps row
                pl.BlockSpec((half, 1), lambda i: (0, 0)),    # resident freqs
            ],
            out_specs=pl.BlockSpec((dim, tb), lambda i: (0, i)),
            compiler_params=compiler_params,
            cost_estimate=pl.CostEstimate(
                flops=2 * b_pad * dim,
                transcendentals=b_pad * dim,
                bytes_accessed=4 * (b_pad * (dim + 1) + half),
            ),
        )(x_row, freqs_col)

        out = out_t.T                       # layout plumbing back to (B, dim)
        return out[:b] if b_pad != b else out

    # Row layout (half % 128 == 0, or odd sublane split): stores already
    # lane-aligned and full-width.
    unit = 8
    max_tile = max((min(block_rows, vmem_cap_elems) // unit) * unit, unit)
    tb = _pick_tile(b, unit, max_tile)
    b_pad = _round_up(b, tb)

    x_col = x.astype(jnp.float32).reshape(b, 1)
    if b_pad != b:
        x_col = jnp.pad(x_col, ((0, b_pad - b), (0, 0)))
    freqs_row = freqs.reshape(1, half)

    out = pl.pallas_call(
        _sinusoidal_kernel_rows,
        out_shape=jax.ShapeDtypeStruct((b_pad, dim), jnp.float32),
        grid=(b_pad // tb,),
        in_specs=[
            pl.BlockSpec((tb, 1), lambda i: (i, 0)),          # timesteps col
            pl.BlockSpec((1, half), lambda i: (0, 0)),        # resident freqs
        ],
        out_specs=pl.BlockSpec((tb, dim), lambda i: (i, 0)),
        compiler_params=compiler_params,
        cost_estimate=pl.CostEstimate(
            flops=2 * b_pad * dim,
            transcendentals=b_pad * dim,
            bytes_accessed=4 * (b_pad * (dim + 1) + half),
        ),
    )(x_col, freqs_row)

    return out[:b] if b_pad != b else out


def _reference(x, dim):
    """Pure-JAX reference mirroring the PyTorch forward."""
    x = jnp.squeeze(x)
    if x.ndim == 0:
        x = x.reshape(1)
    x = x.astype(jnp.float32) * 1000.0
    half = dim // 2
    emb = math.log(10000.0) / (half - 1)
    emb = jnp.exp(jnp.arange(half, dtype=jnp.float32) * -emb)
    emb = x[:, None] * emb[None, :]
    return jnp.concatenate([jnp.sin(emb), jnp.cos(emb)], axis=-1)


if __name__ == "__main__":
    key = jax.random.PRNGKey(0)

    # 1) Module-consistent small shape: SinusoidalPosEmb(dim=32) on a (B, 1)
    #    column of 8 diffusion timesteps (forward squeezes it).  Exercises the
    #    transposed, lane-dense-output path with a single grid step.
    B, DIM = 8, 32
    x = jax.random.uniform(key, (B, 1), dtype=jnp.float32)
    out = sinusoidal_pos_emb(x, DIM)
    jax.block_until_ready(out)
    ref = _reference(x, DIM)
    assert out.shape == (B, DIM)
    assert jnp.allclose(out, ref, atol=1e-5, rtol=1e-5)

    # 2) Larger batch: multi-step grid (>= 2 steps for v7x) + lane padding.
    B2 = 300
    x2 = jax.random.uniform(jax.random.PRNGKey(1), (B2,), dtype=jnp.float32)
    out2 = sinusoidal_pos_emb(x2, DIM)
    jax.block_until_ready(out2)
    ref2 = _reference(x2, DIM)
    assert out2.shape == (B2, DIM)
    assert jnp.allclose(out2, ref2, atol=1e-5, rtol=1e-5)

    # 3) dim multiple of 256 (half % 128 == 0): row-layout path.
    B3, DIM3 = 16, 256
    x3 = jax.random.uniform(jax.random.PRNGKey(2), (B3,), dtype=jnp.float32)
    out3 = sinusoidal_pos_emb(x3, DIM3)
    jax.block_until_ready(out3)
    ref3 = _reference(x3, DIM3)
    assert out3.shape == (B3, DIM3)
    assert jnp.allclose(out3, ref3, atol=1e-5, rtol=1e-5)

    print("KERNEL_OK")
</pallas_src>

<mosaic_0001>
module attributes {stable_mosaic.version = 11 : i64} {
  func.func @_sinusoidal_kernel_t(%arg0: i32, %arg1: memref<1x128xf32, #tpu.memory_space<vmem>>, %arg2: memref<16x1xf32, #tpu.memory_space<vmem>>, %arg3: memref<32x128xf32, #tpu.memory_space<vmem>>) attributes {dimension_semantics = [#tpu.dimension_semantics<parallel>], iteration_bounds = array<i64: 1>, scalar_prefetch = 0 : i64, scratch_operands = 0 : i64, tpu.core_type = #tpu.core_type<tc>, window_params = [{transform_indices = @transform_0, window_bounds = array<i64: 1, 128>}, {pipeline_mode = #tpu.pipeline_mode<synchronous>, transform_indices = @transform_1, window_bounds = array<i64: 16, 1>}, {transform_indices = @transform_2, window_bounds = array<i64: 32, 128>}]} {
    %c0 = arith.constant 0 : index
    %c0_0 = arith.constant 0 : index
    %0 = vector.load %arg1[%c0, %c0_0] : memref<1x128xf32, #tpu.memory_space<vmem>>, vector<1x128xf32>
    %cst = arith.constant 1.000000e+03 : f32
    %1 = vector.broadcast %cst : f32 to vector<1x128xf32>
    %2 = arith.mulf %0, %1 : vector<1x128xf32>
    %c0_1 = arith.constant 0 : index
    %c0_2 = arith.constant 0 : index
    %3 = vector.load %arg2[%c0_1, %c0_2] : memref<16x1xf32, #tpu.memory_space<vmem>>, vector<16x1xf32>
    %4 = vector.broadcast %3 : vector<16x1xf32> to vector<16x128xf32>
    %5 = vector.broadcast %2 : vector<1x128xf32> to vector<16x128xf32>
    %6 = arith.mulf %4, %5 : vector<16x128xf32>
    %7 = math.sin %6 : vector<16x128xf32>
    %c0_3 = arith.constant 0 : index
    %c0_4 = arith.constant 0 : index
    %8 = vector.load %arg3[%c0_3, %c0_4] : memref<32x128xf32, #tpu.memory_space<vmem>>, vector<16x128xf32>
    tpu.vector_store %arg3[%c0_3, %c0_4], %7 {strides = array<i32>} : memref<32x128xf32, #tpu.memory_space<vmem>>, vector<16x128xf32>,
    %9 = math.cos %6 : vector<16x128xf32>
    %c16 = arith.constant 16 : index
    %c0_5 = arith.constant 0 : index
    %10 = vector.load %arg3[%c16, %c0_5] : memref<32x128xf32, #tpu.memory_space<vmem>>, vector<16x128xf32>
    tpu.vector_store %arg3[%c16, %c0_5], %9 {strides = array<i32>} : memref<32x128xf32, #tpu.memory_space<vmem>>, vector<16x128xf32>,
    return
  }
  func.func @transform_0(%arg0: i32) -> (i32, i32) {
    %c0_i32 = arith.constant 0 : i32
    %c0_i32_0 = arith.constant 0 : i32
    return %c0_i32, %arg0 : i32, i32
  }
  func.func @transform_1(%arg0: i32) -> (i32, i32) {
    %c0_i32 = arith.constant 0 : i32
    %c0_i32_0 = arith.constant 0 : i32
    %c0_i32_1 = arith.constant 0 : i32
    return %c0_i32, %c0_i32_0 : i32, i32
  }
  func.func @transform_2(%arg0: i32) -> (i32, i32) {
    %c0_i32 = arith.constant 0 : i32
    %c0_i32_0 = arith.constant 0 : i32
    return %c0_i32, %arg0 : i32, i32
  }
}

</mosaic_0001>

<bundles_post_ra>
// kernel: tpu_custom_call.1
= control target key start
LH: loop header
LB: loop body
LE: loop exit
PB: predicated region body
PF: predicated region fallthrough
CT: control target
= control target key end

     0   :  { %v535_v1 = vmov 0   ;;  %s641_s0 = inlined_call_operand.vmem [shape: f32[1,128], index: 0, kind: input, shape index: {}]   ;;  %s642_s1 = inlined_call_operand.vmem [shape: f32[16,1], index: 1, kind: input, shape index: {}]   ;;  %s643_s2 = inlined_call_operand.hbm [shape: f32[32,128], index: 2, kind: output, shape index: {}]  }
   0x1   :  { %v14_v0 = vld [vmem:[%s642_s1] sm:$0xff]  ;;  %502 = vset.pattern.permute.xlu0 %v535_v1  ;;  %v15_v2 = vld [vmem:[%s642_s1 + $0x8] sm:$0xff] }
   0x2   :  { %18 = vperm.xlu0 %502, %v14_v0  }
   0x3   :  { %7 = vsyncpa [#allocation3], 0  ;;  %v27_v3 = vlaneseq  ;;  %v12_v5 = vld [vmem:[%s641_s0] sm:$0x1]  ;;  %v536_v29 = vmov 683565275  }
   0x4   :  { %v13_v7 = vmul.f32 1000.0, %v12_v5  ;;  %v537_v33 = vmov 2475754826   ;;  %v538_v35 = vmov 2131351028   ;;  %s542_s0 = smov [#allocation2]  }
   0x5   :  { %v28_v4 = vshrl.u32 %v27_v3, 7  ;;  %v539_v37 = vmov 2102212464   ;;  %v540_v39 = vmov 920167782   ;;  %s457_s1 = sshll.u32 %s542_s0, 4  ;;  %s458_s1 = int_to_ptr.vmem [resolvable:$true] %s457_s1 }
   0x6   :  { %23 = vperm.xlu0 %502, %v15_v2   ;;  %v541_v46 = vmov 1326507024   ;;  %s511_s15 = scalar_lea.vmem %s458_s1, 512  ;;  %p516_p1 = scmp.lt.s32.totalorder %s458_s1, %s458_s1 }
   0x7   :  { %v29_v6 = vsub.s32 0, %v28_v4  ;;  %p512_p0 = scmp.ne.s32.totalorder %s458_s1, %s511_s15  ;;  %p517_p2 = scmp.lt.s32.totalorder %s511_s15, %s511_s15 }
   0x9   :  { %v30_v8 = vrot.slane %v13_v7, %v29_v6  ;;  %p518_p3 = por %p517_p2, %p516_p1 }
   0xb   :  { %p519_p4 = pnand %p518_p3, %p512_p0 }
  0x81   :  { %v19_v9 = vpop.permute.xlu0 %18 }
  0x82   :  { %v569_v10 = vmul.f32 %v30_v8, %v19_v9 }
  0x84   :  { %v34_v11 = vand.u32 2147483647, %v569_v10  ;;  %v37_v12 = vand.u32 2139095040, %v569_v10  ;;  %vm36_vm14 = vcmp.lt.s32.totalorder %v569_v10, 0 }
  0x85   :  { %v24_v13 = vpop.permute.xlu0 %23 }
  0x86   :  { %v38_v14 = vshrl.u32 %v37_v12, 23  ;;  %v573_v15 = vmul.f32 %v30_v8, %v24_v13  ;;  %v41_v16 = vand.u32 8388607, %v34_v11  ;;  %vm35_vm15 = vcmp.le.f32.partialorder %v34_v11, 0.7853982 }
  0x88   :  { %v468_v17 = vadd.s32 4294967169, %v38_v14  ;;  %v141_v18 = vand.u32 2139095040, %v573_v15  ;;  %v42_v20 = vor.u32 8388608, %v41_v16  ;;  %v138_v22 = vand.u32 2147483647, %v573_v15 }
  0x8a   :  { %v44_v19 = vadd.s32 1, %v468_v17  ;;  %v142_v21 = vshrl.u32 %v141_v18, 23  ;;  %v579_v27 = vshll.u32 %v42_v20, 8  ;;  %v145_v31 = vand.u32 8388607, %v138_v22 }
  0x8c   :  { %vm45_vm0 = vcmp.gt.s32.totalorder %v44_v19, 0  ;;  %v472_v24 = vadd.s32 4294967169, %v142_v21  ;;  %v146_v61 = vor.u32 8388608, %v145_v31 }
  0x8d   :  { %v46_v23 = vsel %vm45_vm0, %v44_v19, 0  ;;  %vm140_vm0 = vcmp.lt.s32.totalorder %v573_v15, 0 }
  0x8e   :  { %v47_v25 = vshrl.u32 %v46_v23, 5  ;;  %v48_v26 = vand.u32 31, %v46_v23  ;;  %v148_v32 = vadd.s32 1, %v472_v24  ;;  %v186_v12 = vshll.u32 %v146_v61, 8 }
  0x90   :  { %v49_v28 = vsub.s32 32, %v48_v26  ;;  %v51_v30 = vshll.u32 %v536_v29, %v48_v26  ;;  %v54_v34 = vshll.u32 %v537_v33, %v48_v26  ;;  %v57_v36 = vshll.u32 %v538_v35, %v48_v26 }
  0x91   :  { %v60_v38 = vshll.u32 %v539_v37, %v48_v26  ;;  %v63_v40 = vshll.u32 %v540_v39, %v48_v26  ;;  %vm66_vm1 = vcmp.lt.s32.totalorder %v47_v25, 1  ;;  %vm68_vm2 = vcmp.lt.s32.totalorder %v47_v25, 3 }
  0x92   :  { %v52_v41 = vshrl.u32 %v537_v33, %v49_v28  ;;  %v55_v42 = vshrl.u32 %v538_v35, %v49_v28  ;;  %v58_v43 = vshrl.u32 %v539_v37, %v49_v28  ;;  %v50_v44 = vshrl.u32 %v536_v29, %v49_v28 }
  0x93   :  { %v61_v45 = vshrl.u32 %v540_v39, %v49_v28  ;;  %v64_v47 = vshrl.u32 %v541_v46, %v49_v28  ;;  %vm149_vm3 = vcmp.gt.s32.totalorder %v148_v32, 0  ;;  %vm69_vm4 = vcmp.lt.s32.totalorder %v47_v25, 4 }
  0x94   :  { %v53_v48 = vor.u32 %v52_v41, %v51_v30  ;;  %v56_v49 = vor.u32 %v55_v42, %v54_v34  ;;  %v59_v50 = vor.u32 %v58_v43, %v57_v36  ;;  %v150_v53 = vsel %vm149_vm3, %v148_v32, 0 }
  0x95   :  { %v62_v51 = vor.u32 %v61_v45, %v60_v38  ;;  %v65_v52 = vor.u32 %v64_v47, %v63_v40  ;;  %vm67_vm5 = vcmp.lt.s32.totalorder %v47_v25, 2  ;;  %v152_v0 = vand.u32 31, %v150_v53 }
  0x96   :  { %v70_v54 = vsel %vm66_vm1, %v50_v44, %v53_v48  ;;  %v71_v55 = vsel %vm69_vm4, %v59_v50, 2102212464  ;;  %v74_v56 = vsel %vm66_vm1, %v53_v48, %v56_v49  ;;  %v78_v57 = vsel %vm66_vm1, %v56_v49, %v59_v50 }
  0x97   :  { %v72_v58 = vsel %vm68_vm2, %v56_v49, %v71_v55  ;;  %v75_v59 = vsel %vm69_vm4, %v62_v51, 920167782  ;;  %v79_v60 = vsel %vm69_vm4, %v65_v52, 1326507024  ;;  %v151_v8 = vshrl.u32 %v150_v53, 5 }
  0x98   :  { %v76_v62 = vsel %vm68_vm2, %v59_v50, %v75_v59  ;;  %v80_v63 = vsel %vm68_vm2, %v62_v51, %v79_v60  ;;  %v73_v1 = vsel %vm67_vm5, %v70_v54, %v72_v58  ;;  %v153_v9 = vsub.s32 32, %v152_v0 }
  0x99   :  { %v77_v2 = vsel %vm67_vm5, %v74_v56, %v76_v62  ;;  %v81_v3 = vsel %vm67_vm5, %v78_v57, %v80_v63  ;;  %v89_v13 = vmul.u32 %v579_v27, %v73_v1  ;;  %v155_v14 = vshll.u32 %v536_v29, %v152_v0 }
  0x9a   :  { %v592_v4 = vmul.u32.u64.low %v579_v27, %v81_v3  ;;  %v593_v5 = vmul.u32.u64.high %v579_v27, %v81_v3, %v592_v4  ;;  %v596_v6 = vmul.u32.u64.low %v579_v27, %v77_v2  ;;  %v597_v7 = vmul.u32.u64.high %v579_v27, %v77_v2, %v596_v6 }
  0x9b   :  { %v158_v16 = vshll.u32 %v537_v33, %v152_v0  ;;  %v161_v17 = vshll.u32 %v538_v35, %v152_v0  ;;  %v156_v18 = vshrl.u32 %v537_v33, %v153_v9  ;;  %v159_v19 = vshrl.u32 %v538_v35, %v153_v9 }
  0x9c   :  { %v162_v20 = vshrl.u32 %v539_v37, %v153_v9  ;;  %v164_v21 = vshll.u32 %v539_v37, %v152_v0  ;;  %vm91_vm6 = vc.u32 %v593_v5, %v596_v6  ;;  %v92_v23 = vadd.s32 1, %v597_v7 }
  0x9d   :  { %v165_v24 = vshrl.u32 %v540_v39, %v153_v9  ;;  %v167_v25 = vshll.u32 %v540_v39, %v152_v0  ;;  %v157_v26 = vor.u32 %v156_v18, %v155_v14  ;;  %v160_v28 = vor.u32 %v159_v19, %v158_v16 }
  0x9e   :  { %v163_v30 = vor.u32 %v162_v20, %v161_v17  ;;  %v168_v31 = vshrl.u32 %v541_v46, %v153_v9  ;;  %v93_v27 = vsel %vm91_vm6, %v92_v23, %v597_v7  ;;  %vm170_vm7 = vcmp.lt.s32.totalorder %v151_v8, 1 }
  0x9f   :  { %v166_v32 = vor.u32 %v165_v24, %v164_v21  ;;  %vm173_vm8 = vcmp.lt.s32.totalorder %v151_v8, 4  ;;  %v94_v33 = vadd.s32 %v93_v27, %v89_v13  ;;  %vm172_vm9 = vcmp.lt.s32.totalorder %v151_v8, 3 }
  0xa0   :  { %v169_v34 = vor.u32 %v168_v31, %v167_v25  ;;  %v175_v35 = vsel %vm173_vm8, %v163_v30, 2102212464  ;;  %v154_v36 = vshrl.u32 %v536_v29, %v153_v9  ;;  %v178_v37 = vsel %vm170_vm7, %v157_v26, %v160_v28 }
  0xa1   :  { %v179_v38 = vsel %vm173_vm8, %v166_v32, 920167782  ;;  %v182_v40 = vsel %vm170_vm7, %v160_v28, %v163_v30  ;;  %v95_v41 = vadd.s32 536870912, %v94_v33  ;;  %vm171_vm10 = vcmp.lt.s32.totalorder %v151_v8, 2 }
  0xa2   :  { %v180_v39 = vsel %vm172_vm9, %v163_v30, %v179_v38  ;;  %v183_v42 = vsel %vm173_vm8, %v169_v34, 1326507024  ;;  %v174_v43 = vsel %vm170_vm7, %v154_v36, %v157_v26  ;;  %v176_v44 = vsel %vm172_vm9, %v160_v28, %v175_v35 }
  0xa3   :  { %v181_v45 = vsel %vm171_vm10, %v178_v37, %v180_v39  ;;  %v184_v46 = vsel %vm172_vm9, %v166_v32, %v183_v42  ;;  %v96_v47 = vshrl.u32 %v95_v41, 30  ;;  %v177_v53 = vsel %vm171_vm10, %v174_v43, %v176_v44 }
  0xa4   :  { %v185_v48 = vsel %vm171_vm10, %v182_v40, %v184_v46  ;;  %v607_v49 = vmul.u32.u64.low %v186_v12, %v181_v45  ;;  %v608_v50 = vmul.u32.u64.high %v186_v12, %v181_v45, %v607_v49  ;;  %v193_v56 = vmul.u32 %v186_v12, %v177_v53 }
  0xa5   :  { %v610_v51 = vmul.u32.u64.low %v186_v12, %v185_v48  ;;  %v611_v52 = vmul.u32.u64.high %v186_v12, %v185_v48, %v610_v51  ;;  %v97_v29 = vshll.u32 %v96_v47, 30  ;;  %v90_v4 = vadd.s32 %v596_v6, %v593_v5 }
  0xa6   :  { %v196_v55 = vadd.s32 1, %v608_v50  ;;  %v120_v26 = vsub.s32 4, %v96_v47  ;;  %vm139_vm1 = vcmp.le.f32.partialorder %v138_v22, 0.7853982  ;;  %vm126_vm8 = vweird.f32 %v569_v10 }
  0xa7   :  { %v98_v54 = vsub.s32 %v94_v33, %v97_v29  ;;  %vm195_vm11 = vc.u32 %v611_v52, %v607_v49  ;;  %v194_v5 = vadd.s32 %v607_v49, %v611_v52 }
  0xa8   :  { %v197_v58 = vsel %vm195_vm11, %v196_v55, %v608_v50  ;;  %v121_v35 = vsel %vm36_vm14, %v120_v26, %v96_v47 }
  0xa9   :  { %v100_v57 = vsub.s32 0, %v98_v54  ;;  %v198_v59 = vadd.s32 %v197_v58, %v193_v56  ;;  %v123_v40 = vsel %vm35_vm15, 0, %v121_v35 }
  0xaa   :  { %v127_v43 = vadd.s32 3, %v123_v40  ;;  %v337_v46 = vand.u32 3, %v123_v40 }
  0xab   :  { %v469_v60 = vmin.u32 %v100_v57, %v98_v54  ;;  %v199_v61 = vadd.s32 536870912, %v198_v59 }
  0xac   :  { %v128_v49 = vand.u32 3, %v127_v43  ;;  %vm342_vm2 = vcmp.eq.s32.totalorder %v337_v46, 2  ;;  %vm339_vm5 = vcmp.eq.s32.totalorder %v337_v46, 0  ;;  %vm338_vm7 = vcmp.lt.s32.totalorder %v337_v46, 2 }
  0xad   :  { %v102_v62 = vclz %v469_v60  ;;  %v200_v63 = vshrl.u32 %v199_v61, 30 }
  0xae   :  { %vm133_vm3 = vcmp.eq.s32.totalorder %v128_v49, 2  ;;  %vm130_vm4 = vcmp.eq.s32.totalorder %v128_v49, 0  ;;  %vm129_vm6 = vcmp.lt.s32.totalorder %v128_v49, 2 }
  0xaf   :  { %v470_v0 = vadd.s32 4294967294, %v102_v62  ;;  %v201_v1 = vshll.u32 %v200_v63, 30  ;;  %v224_v45 = vsub.s32 4, %v200_v63 }
  0xb1   :  { %vm471_vm12 = vcmp.lt.s32.totalorder %v470_v0, 0  ;;  %v202_v3 = vsub.s32 %v198_v59, %v201_v1  ;;  %v225_v47 = vsel %vm140_vm0, %v224_v45, %v200_v63 }
  0xb2   :  { %v105_v2 = vsel %vm471_vm12, 0, %v470_v0 }
  0xb3   :  { %v106_v7 = vsub.s32 32, %v105_v2  ;;  %v110_v8 = vsub.s32 4294967266, %v105_v2  ;;  %v204_v9 = vsub.s32 0, %v202_v3  ;;  %v107_v12 = vshll.u32 %v98_v54, %v105_v2 }
  0xb4   :  { %v227_v54 = vsel %vm139_vm1, 0, %v225_v47 }
  0xb5   :  { %v108_v13 = vshrl.u32 %v90_v4, %v106_v7  ;;  %v111_v14 = vadd.s32 127, %v110_v8  ;;  %v473_v16 = vmin.u32 %v204_v9, %v202_v3  ;;  %v231_v60 = vadd.s32 3, %v227_v54 }
  0xb6   :  { %v440_v0 = vand.u32 3, %v227_v54 }
  0xb7   :  { %v109_v17 = vor.u32 %v108_v13, %v107_v12  ;;  %v112_v18 = vshll.u32 %v111_v14, 23  ;;  %v206_v19 = vclz %v473_v16  ;;  %v232_v63 = vand.u32 3, %v231_v60 }
  0xb8   :  { %vm445_vm10 = vcmp.eq.s32.totalorder %v440_v0, 2  ;;  %vm442_vm12 = vcmp.eq.s32.totalorder %v440_v0, 0 }
  0xb9   :  { %v113_v20 = vor.u32 4788187, %v112_v18  ;;  %v474_v21 = vadd.s32 4294967294, %v206_v19  ;;  %v116_v24 = vcvt.s32.f32 %v109_v17  ;;  %vm237_vm9 = vcmp.eq.s32.totalorder %v232_v63, 2 }
  0xba   :  { %vm234_vm11 = vcmp.eq.s32.totalorder %v232_v63, 0 }
  0xbb   :  { %v114_v23 = vand.u32 2147483647, %v113_v20  ;;  %vm475_vm13 = vcmp.lt.s32.totalorder %v474_v21, 0 }
  0xbc   :  { %v209_v28 = vsel %vm475_vm13, 0, %v474_v21  ;;  %vm233_vm13 = vcmp.lt.s32.totalorder %v232_v63, 2 }
  0xbd   :  { %v117_v25 = vmul.f32 %v116_v24, %v114_v23  ;;  %v210_v6 = vsub.s32 32, %v209_v28  ;;  %v214_v30 = vsub.s32 4294967266, %v209_v28  ;;  %v211_v27 = vshll.u32 %v202_v3, %v209_v28 }
  0xbf   :  { %v118_v31 = vxor.u32 2147483648, %v117_v25  ;;  %v212_v32 = vshrl.u32 %v194_v5, %v210_v6  ;;  %v215_v33 = vadd.s32 127, %v214_v30 }
  0xc1   :  { %v119_v34 = vsel %vm36_vm14, %v118_v31, %v117_v25  ;;  %v213_v37 = vor.u32 %v212_v32, %v211_v27  ;;  %v216_v38 = vshll.u32 %v215_v33, 23  ;;  %vm441_vm14 = vcmp.lt.s32.totalorder %v440_v0, 2 }
  0xc2   :  { %v122_v36 = vsel %vm35_vm15, %v569_v10, %v119_v34  ;;  %vm230_vm15 = vweird.f32 %v573_v15 }
  0xc3   :  { %503 = vcosq.f32 %v122_v36  ;;  %v217_v41 = vor.u32 4788187, %v216_v38  ;;  %v220_v42 = vcvt.s32.f32 %v213_v37 }
  0xc4   :  { %505 = vsinq.f32 %v122_v36 }
  0xc5   :  { %v218_v39 = vand.u32 2147483647, %v217_v41 }
  0xc7   :  { %v221_v44 = vmul.f32 %v220_v42, %v218_v39 }
  0xc9   :  { %v222_v48 = vxor.u32 2147483648, %v221_v44 }
  0xcb   :  { %v223_v11 = vsel %vm140_vm0, %v222_v48, %v221_v44 }
  0xcc   :  { %v226_v51 = vsel %vm139_vm1, %v573_v15, %v223_v11 }
  0xcd   :  { %v504_v50 = vpop.eup %503  ;;  %507 = vcosq.f32 %v226_v51 }
  0xce   :  { %v506_v52 = vpop.eup %505  ;;  %v134_v29 = vxor.u32 2147483648, %v504_v50  ;;  %509 = vsinq.f32 %v226_v51 }
  0xcf   :  { %v131_v53 = vxor.u32 2147483648, %v506_v52 }
  0xd0   :  { %v135_v55 = vsel %vm133_vm3, %v134_v29, %v506_v52  ;;  %v344_v56 = vsel %vm342_vm2, %v134_v29, %v506_v52 }
  0xd1   :  { %v132_v57 = vsel %vm130_vm4, %v504_v50, %v131_v53  ;;  %v341_v22 = vsel %vm339_vm5, %v504_v50, %v131_v53 }
  0xd2   :  { %v136_v58 = vsel %vm129_vm6, %v132_v57, %v135_v55  ;;  %v345_v59 = vsel %vm338_vm7, %v341_v22, %v344_v56 }
  0xd3   :  { %v137_v61 = vsel %vm126_vm8, nan, %v136_v58  ;;  %v346_v62 = vsel %vm126_vm8, nan, %v345_v59 }
  0xd4   :  { %242 = vst [vmem:[#allocation2] sm:$0xff] %v137_v61  ;;  %450 = vst [vmem:[#allocation2 + $0x10] sm:$0xff] %v346_v62 }
  0xd7   :  { %v508_v1 = vpop.eup %507 }
  0xd8   :  { %v510_v2 = vpop.eup %509  ;;  %v238_v3 = vxor.u32 2147483648, %v508_v1 }
  0xd9   :  { %v235_v4 = vxor.u32 2147483648, %v510_v2 }
  0xda   :  { %v239_v7 = vsel %vm237_vm9, %v238_v3, %v510_v2  ;;  %v447_v10 = vsel %vm445_vm10, %v238_v3, %v510_v2 }
  0xdb   :  { %v236_v8 = vsel %vm234_vm11, %v508_v1, %v235_v4  ;;  %v444_v9 = vsel %vm442_vm12, %v508_v1, %v235_v4 }
  0xdc   :  { %v240_v12 = vsel %vm233_vm13, %v236_v8, %v239_v7  ;;  %v448_v13 = vsel %vm441_vm14, %v444_v9, %v447_v10 }
  0xdd   :  { %v241_v14 = vsel %vm230_vm15, nan, %v240_v12  ;;  %v449_v16 = vsel %vm230_vm15, nan, %v448_v13 }
  0xde   :  { %243 = vst [vmem:[#allocation2 + $0x8] sm:$0xff] %v241_v14  ;;  %451 = vst [vmem:[#allocation2 + $0x18] sm:$0xff] %v449_v16 }
  0xdf   :  { %522 = shalt.err (!%p519_p4)
}
  0xe0   :  { %s523_s18 = scalar_lea.hbm %s643_s2, 512 }
  0xe1   :  { %p524_p5 = scmp.ne.s32.totalorder %s643_s2, %s523_s18  ;;  %p527_p6 = scmp.lt.u32.totalorder %s523_s18, %s643_s2 }
  0xe3   :  { %p529_p7 = pnand %p527_p6, %p524_p5 }
  0xe5   :  { %532 = shalt.err (!%p529_p7)
}
  0xe6   :  { %s543_s23 = smov 128   ;;  %s544_s24 = smov 8  }
  0xe7   :  { %463 = dma.vmem_to_hbm [thread:$0]  %s458_s1, 512, %s643_s2, [#allocation3], %s543_s23, %s543_s23, %s544_s24  }
  0xe8   :  { %533 = dma.done.wait [#allocation3], 512  }
  0xe9   :  { %534 = vsyncadd [#allocation3], 4294966784 }
  0xea   :  { %467 = vsyncpa [#allocation3], 1 }

</bundles_post_ra>
